<compile_context>
chip_gen: v6e
topology: v6e:2x2x1
jax: 0.10.0
libtpu: 0.0.40
codegen_flags: <defaults>
</compile_context>

<pallas_src>
import functools

import jax
import jax.numpy as jnp
from jax.experimental import pallas as pl
from jax.experimental.pallas import tpu as pltpu


def _round_up(x, m):
    return -(-x // m) * m


def _padded_bytes(shape, itemsize):
    """Approximate VMEM bytes of a buffer with (8, 128) minor-tile padding."""
    shape = tuple(int(s) for s in shape)
    if len(shape) < 2:
        return _round_up(shape[0] if shape else 1, 128) * itemsize
    lead = 1
    for s in shape[:-2]:
        lead *= s
    return lead * _round_up(shape[-2], 8) * _round_up(shape[-1], 128) * itemsize


def _vmem_budget_bytes():
    """Usable VMEM budget: 3/4 of the part's capacity when it can be queried
    (96 MiB on v5e/v6e, 48 MiB on v7x), conservative fallback otherwise."""
    try:
        cap = getattr(pltpu.get_tpu_info(), "vmem_capacity_bytes", None)
        if cap:
            return int(cap) * 3 // 4
    except Exception:
        pass
    return 40 * 1024 * 1024  # safe on every current generation (incl. v7x)


def _working_set_bytes(TOH, *, C, Cout, W, OW, SH, KH, in_itemsize, out_itemsize,
                       mxu_itemsize):
    """Real per-step VMEM: double-buffered input/output/weight/bias blocks plus
    the im2row scratch and the row-carry scratch."""
    in_blk = _padded_bytes((C, TOH, SH * W), in_itemsize)
    out_blk = _padded_bytes((Cout, TOH, OW), out_itemsize)
    rhs = _padded_bytes((KH * C * W, Cout * OW), mxu_itemsize)
    bias = _padded_bytes((1, Cout * OW), 4)
    col = _padded_bytes((TOH, KH * C * W), mxu_itemsize)
    carry = _padded_bytes((C, SH * W), in_itemsize)
    # rhs/bias have constant index maps but are still double-buffered by the
    # default pipeline (pl.Buffered(1) would halve them; omitted for portability).
    return 2 * (in_blk + out_blk + rhs + bias) + col + carry


def _pick_out_row_tile(OH, budget_bytes, ws_fn):
    """Largest output-row tile that divides OH, satisfies the (8,128) block rule
    on the row axis, and fits the VMEM working-set budget."""
    cands = [t for t in range(1, OH + 1) if OH % t == 0 and (t % 8 == 0 or t == OH)]
    good = [t for t in cands if ws_fn(t) <= budget_bytes]
    return max(good) if good else min(cands)


def _downsample_conv_kernel(xm_ref, w_ref, b_ref, o_ref, col_ref, carry_ref, *,
                            C, W, OW, TOH, KH, SH, PH, Cout):
    # xm_ref   : (C, TOH, SH*W)   input rows for this tile (TOH groups of SH rows,
    #                             each group flattened along lanes as SH*W)
    # w_ref    : (KH*C*W, Cout*OW) folded weights * column-selection (resident)
    # b_ref    : (1, Cout*OW)     bias, broadcast over OW (f32)
    # o_ref    : (Cout, TOH, OW)  NCHW output block
    # col_ref  : (TOH, KH*C*W)    im2row scratch (MXU LHS), fully rewritten
    # carry_ref: (C, SH*W)        last row group of the previous tile (top halo)
    r = pl.program_id(1)

    if PH > 0:
        prev = carry_ref[...]                              # (C, SH*W)
        # First row tile of each image reads the top zero padding instead.
        prev = jnp.where(r == 0, jnp.zeros_like(prev), prev)

    for kh in range(KH):
        d = kh - PH                       # row offset inside an output-row group
        for ci in range(C):
            t = kh * C + ci
            lo, hi = t * W, (t + 1) * W
            if d >= 0:
                # Rows SH*oh + d live at lanes [d*W, (d+1)*W) of group oh.
                tap = xm_ref[ci:ci + 1, :, d * W:(d + 1) * W][0]       # (TOH, W)
                col_ref[:, lo:hi] = tap.astype(col_ref.dtype)
            else:
                # Row SH*oh + d belongs to group oh-1 (row d+SH of that group).
                dd = d + SH
                col_ref[0:1, lo:hi] = (
                    prev[ci:ci + 1, dd * W:(dd + 1) * W].astype(col_ref.dtype))
                if TOH > 1:
                    tap = xm_ref[ci:ci + 1, :TOH - 1, dd * W:(dd + 1) * W][0]
                    col_ref[1:TOH, lo:hi] = tap.astype(col_ref.dtype)

    if PH > 0:
        # Save the last row group for the next (sequential) row tile.
        carry_ref[...] = xm_ref[:, TOH - 1:TOH, :][:, 0, :]

    # One fused MXU contraction over all taps, channels and kernel columns.
    acc = jnp.dot(col_ref[...], w_ref[...],
                  preferred_element_type=jnp.float32)       # (TOH, Cout*OW)
    acc = acc + b_ref[...]
    # NCHW output block with no XLU transpose: slice per output channel and
    # stack along the leading (untiled) dim.
    o_ref[...] = jnp.stack(
        [acc[:, co * OW:(co + 1) * OW] for co in range(Cout)], axis=0
    ).astype(o_ref.dtype)


def downsample_conv(x_nchw, weight, bias, downsample_ratio=(2, 2), *,
                    block_out_rows=None, mxu_dtype=jnp.bfloat16):
    """Pallas equivalent of Downsample(channels, 'conv', out_channels, ratio)
    .forward for 2-D ratios.  x_nchw: (N, C, H, W); weight: (Cout, C, KH, KW)
    (PyTorch layout); bias: (Cout,).  Returns (N, Cout, H//rh, W//rw) NCHW.
    Note: MXU operands are bf16 (f32 accumulate), so results match a
    bf16-rounded-operand Conv2d rather than a pure-f32 one."""
    assert len(downsample_ratio) == 2, "1-D (Conv1d) ratios not implemented"
    SH, SW = downsample_ratio
    N, C, H, W = x_nchw.shape
    Cout, Cin, KH, KW = weight.shape
    assert Cin == C
    assert KH == 2 * SH - 1 and KW == 2 * SW - 1, "module builds kernel = 2*ratio - 1"
    PH, PW = KH // 2, KW // 2
    assert H % SH == 0 and W % SW == 0, "H and W must be multiples of the ratio"
    OH, OW = H // SH, W // SW
    in_dt = x_nchw.dtype

    budget = _vmem_budget_bytes()
    ws_fn = functools.partial(
        _working_set_bytes, C=C, Cout=Cout, W=W, OW=OW, SH=SH, KH=KH,
        in_itemsize=jnp.dtype(in_dt).itemsize,
        out_itemsize=jnp.dtype(in_dt).itemsize,
        mxu_itemsize=jnp.dtype(mxu_dtype).itemsize)
    TOH = (block_out_rows if block_out_rows is not None
           else _pick_out_row_tile(OH, (budget * 4) // 5, ws_fn))
    assert OH % TOH == 0 and (TOH % 8 == 0 or TOH == OH), (
        "block_out_rows must divide OH and be a multiple of 8 (or equal OH)")
    R = OH // TOH

    # Free bitcast view: split H into (OH, SH) row groups, flatten each group's
    # SH rows along the lane axis.  No data movement, no transpose, no pad.
    x3 = x_nchw.reshape(N, C, OH, SH * W)

    # Fold the weights, the stride-SW column subsampling and the left zero pad
    # into one resident matmul RHS:
    #   rhs[(kh*C+ci)*W + wcol, co*OW + ow] = sum_kw w[co,ci,kh,kw] *
    #                                          [wcol == SW*ow + kw - PW]
    colidx = SW * jnp.arange(OW)[None, :] + jnp.arange(KW)[:, None] - PW   # (KW, OW)
    sel = (jnp.arange(W)[None, :, None] == colidx[:, None, :]).astype(jnp.float32)
    rhs = jnp.einsum('ochk,kwq->hcwoq', weight.astype(jnp.float32), sel,
                     precision=jax.lax.Precision.HIGHEST)
    rhs = rhs.reshape(KH * C * W, Cout * OW).astype(mxu_dtype)
    b_bc = jnp.broadcast_to(bias.astype(jnp.float32)[:, None],
                            (Cout, OW)).reshape(1, Cout * OW)

    kernel = functools.partial(
        _downsample_conv_kernel,
        C=C, W=W, OW=OW, TOH=TOH, KH=KH, SH=SH, PH=PH, Cout=Cout)

    return pl.pallas_call(
        kernel,
        out_shape=jax.ShapeDtypeStruct((N, Cout, OH, OW), in_dt),
        grid_spec=pltpu.PrefetchScalarGridSpec(
            num_scalar_prefetch=0,
            grid=(N, R),
            in_specs=[
                pl.BlockSpec((None, C, TOH, SH * W), lambda n, r: (n, 0, r, 0)),
                pl.BlockSpec((KH * C * W, Cout * OW), lambda n, r: (0, 0)),
                pl.BlockSpec((1, Cout * OW), lambda n, r: (0, 0)),
            ],
            out_specs=pl.BlockSpec((None, Cout, TOH, OW), lambda n, r: (n, 0, r, 0)),
            scratch_shapes=[
                pltpu.VMEM((TOH, KH * C * W), mxu_dtype),   # im2row scratch
                pltpu.VMEM((C, SH * W), in_dt),             # row-group carry
            ],
        ),
        # The row axis must stay sequential ("arbitrary") because of the halo
        # carry; the batch axis is "parallel" for megacore / v7x's two cores.
        compiler_params=pltpu.CompilerParams(
            dimension_semantics=("parallel", "arbitrary"),
            vmem_limit_bytes=int(budget),
        ),
    )(x3, rhs, b_bc)


if __name__ == "__main__":
    # Module config: channels=4, downsample_type='conv', out_channels=None,
    # downsample_ratio=(2, 2) -> Conv2d(4, 4, kernel=(3,3), stride=(2,2), pad=(1,1)).
    channels = 4
    out_channels = channels
    ratio = (2, 2)
    KH, KW = 2 * ratio[0] - 1, 2 * ratio[1] - 1

    key = jax.random.PRNGKey(0)
    kx1, kx2, kwt, kb = jax.random.split(key, 4)
    weight = 0.1 * jax.random.normal(kwt, (out_channels, channels, KH, KW), jnp.float32)
    bias = 0.1 * jax.random.normal(kb, (out_channels,), jnp.float32)

    def torch_like_ref(x, w):
        return jax.lax.conv_general_dilated(
            x, w, window_strides=ratio,
            padding=((KH // 2, KH // 2), (KW // 2, KW // 2)),
            dimension_numbers=("NCHW", "OIHW", "NCHW"),
            precision=jax.lax.Precision.HIGHEST,
        ) + bias.reshape(1, -1, 1, 1)

    # The MXU path uses bf16 operands with f32 accumulation: compare tightly
    # against a bf16-rounded-operand reference and loosely against pure f32.
    w_bf = weight.astype(jnp.bfloat16).astype(jnp.float32)

    # Case 1: 16x16 -> 8x8, single row tile per image, grid (2, 1).
    x1 = jax.random.normal(kx1, (2, channels, 16, 16), jnp.float32)
    out1 = jax.block_until_ready(downsample_conv(x1, weight, bias, ratio))
    assert out1.shape == (2, out_channels, 8, 8), out1.shape
    ref1 = torch_like_ref(x1.astype(jnp.bfloat16).astype(jnp.float32), w_bf)
    assert jnp.allclose(out1, ref1, atol=2e-3, rtol=2e-3), \
        float(jnp.max(jnp.abs(out1 - ref1)))
    assert jnp.allclose(out1, torch_like_ref(x1, weight), atol=5e-2, rtol=5e-2)

    # Case 2: 32x32 -> 16x16 with two row tiles per image (TOH=8, grid (2, 2)),
    # exercising the cross-tile row carry and the padded top/left edges.
    x2 = jax.random.normal(kx2, (2, channels, 32, 32), jnp.float32)
    out2 = jax.block_until_ready(
        downsample_conv(x2, weight, bias, ratio, block_out_rows=8))
    assert out2.shape == (2, out_channels, 16, 16), out2.shape
    ref2 = torch_like_ref(x2.astype(jnp.bfloat16).astype(jnp.float32), w_bf)
    assert jnp.allclose(out2, ref2, atol=2e-3, rtol=2e-3), \
        float(jnp.max(jnp.abs(out2 - ref2)))
    assert jnp.allclose(out2, torch_like_ref(x2, weight), atol=5e-2, rtol=5e-2)

    print("KERNEL_OK")
</pallas_src>

<mosaic_0001>
module attributes {stable_mosaic.version = 11 : i64} {
  func.func @_downsample_conv_kernel(%arg0: i32, %arg1: i32, %arg2: memref<1x4x8x32xf32, #tpu.memory_space<vmem>>, %arg3: memref<192x32xbf16, #tpu.memory_space<vmem>>, %arg4: memref<1x32xf32, #tpu.memory_space<vmem>>, %arg5: memref<1x4x8x8xf32, #tpu.memory_space<vmem>>, %arg6: memref<8x192xbf16, #tpu.memory_space<vmem>>, %arg7: memref<4x32xf32, #tpu.memory_space<vmem>>) attributes {dimension_semantics = [#tpu.dimension_semantics<parallel>, #tpu.dimension_semantics<arbitrary>], iteration_bounds = array<i64: 2, 1>, scalar_prefetch = 0 : i64, scratch_operands = 2 : i64, tpu.core_type = #tpu.core_type<tc>, window_params = [{transform_indices = @transform_0, window_bounds = array<i64: 1, 4, 8, 32>}, {pipeline_mode = #tpu.pipeline_mode<synchronous>, transform_indices = @transform_1, window_bounds = array<i64: 192, 32>}, {pipeline_mode = #tpu.pipeline_mode<synchronous>, transform_indices = @transform_2, window_bounds = array<i64: 1, 32>}, {transform_indices = @transform_3, window_bounds = array<i64: 1, 4, 8, 8>}]} {
    %c0 = arith.constant 0 : index
    %c0_0 = arith.constant 0 : index
    %0 = vector.load %arg7[%c0, %c0_0] : memref<4x32xf32, #tpu.memory_space<vmem>>, vector<4x32xf32>
    %c0_i32 = arith.constant 0 : i32
    %1 = arith.cmpi eq, %arg1, %c0_i32 : i32
    %cst = arith.constant 0.000000e+00 : f32
    %2 = vector.broadcast %cst : f32 to vector<4x32xf32>
    %3 = arith.select %1, %2, %0 : vector<4x32xf32>
    %4 = vector.extract_strided_slice %3 {offsets = [0, 16], sizes = [1, 16], strides = [1, 1]} : vector<4x32xf32> to vector<1x16xf32>
    %5 = arith.truncf %4 : vector<1x16xf32> to vector<1x16xbf16>
    %c0_1 = arith.constant 0 : index
    %c0_2 = arith.constant 0 : index
    %6 = vector.load %arg6[%c0_1, %c0_2] : memref<8x192xbf16, #tpu.memory_space<vmem>>, vector<1x16xbf16>
    tpu.vector_store %arg6[%c0_1, %c0_2], %5 {strides = array<i32>} : memref<8x192xbf16, #tpu.memory_space<vmem>>, vector<1x16xbf16>,
    %c0_3 = arith.constant 0 : index
    %c0_4 = arith.constant 0 : index
    %c0_5 = arith.constant 0 : index
    %c16 = arith.constant 16 : index
    %7 = vector.load %arg2[%c0_3, %c0_4, %c0_5, %c16] : memref<1x4x8x32xf32, #tpu.memory_space<vmem>>, vector<1x1x7x16xf32>
    %8 = vector.shape_cast %7 : vector<1x1x7x16xf32> to vector<1x7x16xf32>
    %9 = vector.shape_cast %8 : vector<1x7x16xf32> to vector<7x16xf32>
    %10 = arith.truncf %9 : vector<7x16xf32> to vector<7x16xbf16>
    %c1 = arith.constant 1 : index
    %c0_6 = arith.constant 0 : index
    %11 = vector.load %arg6[%c1, %c0_6] : memref<8x192xbf16, #tpu.memory_space<vmem>>, vector<7x16xbf16>
    tpu.vector_store %arg6[%c1, %c0_6], %10 {strides = array<i32>} : memref<8x192xbf16, #tpu.memory_space<vmem>>, vector<7x16xbf16>,
    %12 = vector.extract_strided_slice %3 {offsets = [1, 16], sizes = [1, 16], strides = [1, 1]} : vector<4x32xf32> to vector<1x16xf32>
    %13 = arith.truncf %12 : vector<1x16xf32> to vector<1x16xbf16>
    %c0_7 = arith.constant 0 : index
    %c16_8 = arith.constant 16 : index
    %14 = vector.load %arg6[%c0_7, %c16_8] : memref<8x192xbf16, #tpu.memory_space<vmem>>, vector<1x16xbf16>
    tpu.vector_store %arg6[%c0_7, %c16_8], %13 {strides = array<i32>} : memref<8x192xbf16, #tpu.memory_space<vmem>>, vector<1x16xbf16>,
    %c0_9 = arith.constant 0 : index
    %c1_10 = arith.constant 1 : index
    %c0_11 = arith.constant 0 : index
    %c16_12 = arith.constant 16 : index
    %15 = vector.load %arg2[%c0_9, %c1_10, %c0_11, %c16_12] : memref<1x4x8x32xf32, #tpu.memory_space<vmem>>, vector<1x1x7x16xf32>
    %16 = vector.shape_cast %15 : vector<1x1x7x16xf32> to vector<1x7x16xf32>
    %17 = vector.shape_cast %16 : vector<1x7x16xf32> to vector<7x16xf32>
    %18 = arith.truncf %17 : vector<7x16xf32> to vector<7x16xbf16>
    %c1_13 = arith.constant 1 : index
    %c16_14 = arith.constant 16 : index
    %19 = vector.load %arg6[%c1_13, %c16_14] : memref<8x192xbf16, #tpu.memory_space<vmem>>, vector<7x16xbf16>
    tpu.vector_store %arg6[%c1_13, %c16_14], %18 {strides = array<i32>} : memref<8x192xbf16, #tpu.memory_space<vmem>>, vector<7x16xbf16>,
    %20 = vector.extract_strided_slice %3 {offsets = [2, 16], sizes = [1, 16], strides = [1, 1]} : vector<4x32xf32> to vector<1x16xf32>
    %21 = arith.truncf %20 : vector<1x16xf32> to vector<1x16xbf16>
    %c0_15 = arith.constant 0 : index
    %c32 = arith.constant 32 : index
    %22 = vector.load %arg6[%c0_15, %c32] : memref<8x192xbf16, #tpu.memory_space<vmem>>, vector<1x16xbf16>
    tpu.vector_store %arg6[%c0_15, %c32], %21 {strides = array<i32>} : memref<8x192xbf16, #tpu.memory_space<vmem>>, vector<1x16xbf16>,
    %c0_16 = arith.constant 0 : index
    %c2 = arith.constant 2 : index
    %c0_17 = arith.constant 0 : index
    %c16_18 = arith.constant 16 : index
    %23 = vector.load %arg2[%c0_16, %c2, %c0_17, %c16_18] : memref<1x4x8x32xf32, #tpu.memory_space<vmem>>, vector<1x1x7x16xf32>
    %24 = vector.shape_cast %23 : vector<1x1x7x16xf32> to vector<1x7x16xf32>
    %25 = vector.shape_cast %24 : vector<1x7x16xf32> to vector<7x16xf32>
    %26 = arith.truncf %25 : vector<7x16xf32> to vector<7x16xbf16>
    %c1_19 = arith.constant 1 : index
    %c32_20 = arith.constant 32 : index
    %27 = vector.load %arg6[%c1_19, %c32_20] : memref<8x192xbf16, #tpu.memory_space<vmem>>, vector<7x16xbf16>
    tpu.vector_store %arg6[%c1_19, %c32_20], %26 {strides = array<i32>} : memref<8x192xbf16, #tpu.memory_space<vmem>>, vector<7x16xbf16>,
    %28 = vector.extract_strided_slice %3 {offsets = [3, 16], sizes = [1, 16], strides = [1, 1]} : vector<4x32xf32> to vector<1x16xf32>
    %29 = arith.truncf %28 : vector<1x16xf32> to vector<1x16xbf16>
    %c0_21 = arith.constant 0 : index
    %c48 = arith.constant 48 : index
    %30 = vector.load %arg6[%c0_21, %c48] : memref<8x192xbf16, #tpu.memory_space<vmem>>, vector<1x16xbf16>
    tpu.vector_store %arg6[%c0_21, %c48], %29 {strides = array<i32>} : memref<8x192xbf16, #tpu.memory_space<vmem>>, vector<1x16xbf16>,
    %c0_22 = arith.constant 0 : index
    %c3 = arith.constant 3 : index
    %c0_23 = arith.constant 0 : index
    %c16_24 = arith.constant 16 : index
    %31 = vector.load %arg2[%c0_22, %c3, %c0_23, %c16_24] : memref<1x4x8x32xf32, #tpu.memory_space<vmem>>, vector<1x1x7x16xf32>
    %32 = vector.shape_cast %31 : vector<1x1x7x16xf32> to vector<1x7x16xf32>
    %33 = vector.shape_cast %32 : vector<1x7x16xf32> to vector<7x16xf32>
    %34 = arith.truncf %33 : vector<7x16xf32> to vector<7x16xbf16>
    %c1_25 = arith.constant 1 : index
    %c48_26 = arith.constant 48 : index
    %35 = vector.load %arg6[%c1_25, %c48_26] : memref<8x192xbf16, #tpu.memory_space<vmem>>, vector<7x16xbf16>
    tpu.vector_store %arg6[%c1_25, %c48_26], %34 {strides = array<i32>} : memref<8x192xbf16, #tpu.memory_space<vmem>>, vector<7x16xbf16>,
    %c0_27 = arith.constant 0 : index
    %c0_28 = arith.constant 0 : index
    %c0_29 = arith.constant 0 : index
    %c0_30 = arith.constant 0 : index
    %36 = vector.load %arg2[%c0_27, %c0_28, %c0_29, %c0_30] : memref<1x4x8x32xf32, #tpu.memory_space<vmem>>, vector<1x1x8x16xf32>
    %37 = vector.shape_cast %36 : vector<1x1x8x16xf32> to vector<1x8x16xf32>
    %38 = vector.shape_cast %37 : vector<1x8x16xf32> to vector<8x16xf32>
    %39 = arith.truncf %38 : vector<8x16xf32> to vector<8x16xbf16>
    %c0_31 = arith.constant 0 : index
    %c64 = arith.constant 64 : index
    %40 = vector.load %arg6[%c0_31, %c64] : memref<8x192xbf16, #tpu.memory_space<vmem>>, vector<8x16xbf16>
    tpu.vector_store %arg6[%c0_31, %c64], %39 {strides = array<i32>} : memref<8x192xbf16, #tpu.memory_space<vmem>>, vector<8x16xbf16>,
    %c0_32 = arith.constant 0 : index
    %c1_33 = arith.constant 1 : index
    %c0_34 = arith.constant 0 : index
    %c0_35 = arith.constant 0 : index
    %41 = vector.load %arg2[%c0_32, %c1_33, %c0_34, %c0_35] : memref<1x4x8x32xf32, #tpu.memory_space<vmem>>, vector<1x1x8x16xf32>
    %42 = vector.shape_cast %41 : vector<1x1x8x16xf32> to vector<1x8x16xf32>
    %43 = vector.shape_cast %42 : vector<1x8x16xf32> to vector<8x16xf32>
    %44 = arith.truncf %43 : vector<8x16xf32> to vector<8x16xbf16>
    %c0_36 = arith.constant 0 : index
    %c80 = arith.constant 80 : index
    %45 = vector.load %arg6[%c0_36, %c80] : memref<8x192xbf16, #tpu.memory_space<vmem>>, vector<8x16xbf16>
    tpu.vector_store %arg6[%c0_36, %c80], %44 {strides = array<i32>} : memref<8x192xbf16, #tpu.memory_space<vmem>>, vector<8x16xbf16>,
    %c0_37 = arith.constant 0 : index
    %c2_38 = arith.constant 2 : index
    %c0_39 = arith.constant 0 : index
    %c0_40 = arith.constant 0 : index
    %46 = vector.load %arg2[%c0_37, %c2_38, %c0_39, %c0_40] : memref<1x4x8x32xf32, #tpu.memory_space<vmem>>, vector<1x1x8x16xf32>
    %47 = vector.shape_cast %46 : vector<1x1x8x16xf32> to vector<1x8x16xf32>
    %48 = vector.shape_cast %47 : vector<1x8x16xf32> to vector<8x16xf32>
    %49 = arith.truncf %48 : vector<8x16xf32> to vector<8x16xbf16>
    %c0_41 = arith.constant 0 : index
    %c96 = arith.constant 96 : index
    %50 = vector.load %arg6[%c0_41, %c96] : memref<8x192xbf16, #tpu.memory_space<vmem>>, vector<8x16xbf16>
    tpu.vector_store %arg6[%c0_41, %c96], %49 {strides = array<i32>} : memref<8x192xbf16, #tpu.memory_space<vmem>>, vector<8x16xbf16>,
    %c0_42 = arith.constant 0 : index
    %c3_43 = arith.constant 3 : index
    %c0_44 = arith.constant 0 : index
    %c0_45 = arith.constant 0 : index
    %51 = vector.load %arg2[%c0_42, %c3_43, %c0_44, %c0_45] : memref<1x4x8x32xf32, #tpu.memory_space<vmem>>, vector<1x1x8x16xf32>
    %52 = vector.shape_cast %51 : vector<1x1x8x16xf32> to vector<1x8x16xf32>
    %53 = vector.shape_cast %52 : vector<1x8x16xf32> to vector<8x16xf32>
    %54 = arith.truncf %53 : vector<8x16xf32> to vector<8x16xbf16>
    %c0_46 = arith.constant 0 : index
    %c112 = arith.constant 112 : index
    %55 = vector.load %arg6[%c0_46, %c112] : memref<8x192xbf16, #tpu.memory_space<vmem>>, vector<8x16xbf16>
    tpu.vector_store %arg6[%c0_46, %c112], %54 {strides = array<i32>} : memref<8x192xbf16, #tpu.memory_space<vmem>>, vector<8x16xbf16>,
    %c0_47 = arith.constant 0 : index
    %c0_48 = arith.constant 0 : index
    %c0_49 = arith.constant 0 : index
    %c16_50 = arith.constant 16 : index
    %56 = vector.load %arg2[%c0_47, %c0_48, %c0_49, %c16_50] : memref<1x4x8x32xf32, #tpu.memory_space<vmem>>, vector<1x1x8x16xf32>
    %57 = vector.shape_cast %56 : vector<1x1x8x16xf32> to vector<1x8x16xf32>
    %58 = vector.shape_cast %57 : vector<1x8x16xf32> to vector<8x16xf32>
    %59 = arith.truncf %58 : vector<8x16xf32> to vector<8x16xbf16>
    %c0_51 = arith.constant 0 : index
    %c128 = arith.constant 128 : index
    %60 = vector.load %arg6[%c0_51, %c128] : memref<8x192xbf16, #tpu.memory_space<vmem>>, vector<8x16xbf16>
    tpu.vector_store %arg6[%c0_51, %c128], %59 {strides = array<i32>} : memref<8x192xbf16, #tpu.memory_space<vmem>>, vector<8x16xbf16>,
    %c0_52 = arith.constant 0 : index
    %c1_53 = arith.constant 1 : index
    %c0_54 = arith.constant 0 : index
    %c16_55 = arith.constant 16 : index
    %61 = vector.load %arg2[%c0_52, %c1_53, %c0_54, %c16_55] : memref<1x4x8x32xf32, #tpu.memory_space<vmem>>, vector<1x1x8x16xf32>
    %62 = vector.shape_cast %61 : vector<1x1x8x16xf32> to vector<1x8x16xf32>
    %63 = vector.shape_cast %62 : vector<1x8x16xf32> to vector<8x16xf32>
    %64 = arith.truncf %63 : vector<8x16xf32> to vector<8x16xbf16>
    %c0_56 = arith.constant 0 : index
    %c144 = arith.constant 144 : index
    %65 = vector.load %arg6[%c0_56, %c144] : memref<8x192xbf16, #tpu.memory_space<vmem>>, vector<8x16xbf16>
    tpu.vector_store %arg6[%c0_56, %c144], %64 {strides = array<i32>} : memref<8x192xbf16, #tpu.memory_space<vmem>>, vector<8x16xbf16>,
    %c0_57 = arith.constant 0 : index
    %c2_58 = arith.constant 2 : index
    %c0_59 = arith.constant 0 : index
    %c16_60 = arith.constant 16 : index
    %66 = vector.load %arg2[%c0_57, %c2_58, %c0_59, %c16_60] : memref<1x4x8x32xf32, #tpu.memory_space<vmem>>, vector<1x1x8x16xf32>
    %67 = vector.shape_cast %66 : vector<1x1x8x16xf32> to vector<1x8x16xf32>
    %68 = vector.shape_cast %67 : vector<1x8x16xf32> to vector<8x16xf32>
    %69 = arith.truncf %68 : vector<8x16xf32> to vector<8x16xbf16>
    %c0_61 = arith.constant 0 : index
    %c160 = arith.constant 160 : index
    %70 = vector.load %arg6[%c0_61, %c160] : memref<8x192xbf16, #tpu.memory_space<vmem>>, vector<8x16xbf16>
    tpu.vector_store %arg6[%c0_61, %c160], %69 {strides = array<i32>} : memref<8x192xbf16, #tpu.memory_space<vmem>>, vector<8x16xbf16>,
    %c0_62 = arith.constant 0 : index
    %c3_63 = arith.constant 3 : index
    %c0_64 = arith.constant 0 : index
    %c16_65 = arith.constant 16 : index
    %71 = vector.load %arg2[%c0_62, %c3_63, %c0_64, %c16_65] : memref<1x4x8x32xf32, #tpu.memory_space<vmem>>, vector<1x1x8x16xf32>
    %72 = vector.shape_cast %71 : vector<1x1x8x16xf32> to vector<1x8x16xf32>
    %73 = vector.shape_cast %72 : vector<1x8x16xf32> to vector<8x16xf32>
    %74 = arith.truncf %73 : vector<8x16xf32> to vector<8x16xbf16>
    %c0_66 = arith.constant 0 : index
    %c176 = arith.constant 176 : index
    %75 = vector.load %arg6[%c0_66, %c176] : memref<8x192xbf16, #tpu.memory_space<vmem>>, vector<8x16xbf16>
    tpu.vector_store %arg6[%c0_66, %c176], %74 {strides = array<i32>} : memref<8x192xbf16, #tpu.memory_space<vmem>>, vector<8x16xbf16>,
    %c0_67 = arith.constant 0 : index
    %c0_68 = arith.constant 0 : index
    %c7 = arith.constant 7 : index
    %c0_69 = arith.constant 0 : index
    %76 = vector.load %arg2[%c0_67, %c0_68, %c7, %c0_69] : memref<1x4x8x32xf32, #tpu.memory_space<vmem>>, vector<1x4x1x32xf32>
    %77 = vector.shape_cast %76 : vector<1x4x1x32xf32> to vector<4x1x32xf32>
    %78 = vector.shape_cast %77 : vector<4x1x32xf32> to vector<4x32xf32>
    %c0_70 = arith.constant 0 : index
    %c0_71 = arith.constant 0 : index
    %79 = vector.load %arg7[%c0_70, %c0_71] : memref<4x32xf32, #tpu.memory_space<vmem>>, vector<4x32xf32>
    tpu.vector_store %arg7[%c0_70, %c0_71], %78 {strides = array<i32>} : memref<4x32xf32, #tpu.memory_space<vmem>>, vector<4x32xf32>,
    %c0_72 = arith.constant 0 : index
    %c0_73 = arith.constant 0 : index
    %80 = vector.load %arg6[%c0_72, %c0_73] : memref<8x192xbf16, #tpu.memory_space<vmem>>, vector<8x192xbf16>
    %c0_74 = arith.constant 0 : index
    %c0_75 = arith.constant 0 : index
    %81 = vector.load %arg3[%c0_74, %c0_75] : memref<192x32xbf16, #tpu.memory_space<vmem>>, vector<192x32xbf16>
    %cst_76 = arith.constant dense<0.000000e+00> : vector<8x32xf32>
    %82 = tpu.matmul %80, %81, %cst_76 {dimension_numbers = #tpu.dot_dimension_numbers<[1], [0], [0], [1], [0, 0, 1, 1], [], []>} : vector<8x192xbf16>, vector<192x32xbf16>, vector<8x32xf32> -> vector<8x32xf32>
    %c0_77 = arith.constant 0 : index
    %c0_78 = arith.constant 0 : index
    %83 = vector.load %arg4[%c0_77, %c0_78] : memref<1x32xf32, #tpu.memory_space<vmem>>, vector<1x32xf32>
    %84 = vector.broadcast %83 : vector<1x32xf32> to vector<8x32xf32>
    %85 = arith.addf %82, %84 : vector<8x32xf32>
    %86 = vector.extract_strided_slice %85 {offsets = [0, 0], sizes = [8, 8], strides = [1, 1]} : vector<8x32xf32> to vector<8x8xf32>
    %87 = vector.extract_strided_slice %85 {offsets = [0, 8], sizes = [8, 8], strides = [1, 1]} : vector<8x32xf32> to vector<8x8xf32>
    %88 = vector.extract_strided_slice %85 {offsets = [0, 16], sizes = [8, 8], strides = [1, 1]} : vector<8x32xf32> to vector<8x8xf32>
    %89 = vector.extract_strided_slice %85 {offsets = [0, 24], sizes = [8, 8], strides = [1, 1]} : vector<8x32xf32> to vector<8x8xf32>
    %90 = vector.shape_cast %86 : vector<8x8xf32> to vector<1x8x8xf32>
    %91 = vector.shape_cast %87 : vector<8x8xf32> to vector<1x8x8xf32>
    %92 = vector.shape_cast %88 : vector<8x8xf32> to vector<1x8x8xf32>
    %93 = vector.shape_cast %89 : vector<8x8xf32> to vector<1x8x8xf32>
    %94 = tpu.concatenate %90, %91, %92, %93 in 0 : vector<1x8x8xf32>, vector<1x8x8xf32>, vector<1x8x8xf32>, vector<1x8x8xf32> -> vector<4x8x8xf32>
    %c0_79 = arith.constant 0 : index
    %c0_80 = arith.constant 0 : index
    %c0_81 = arith.constant 0 : index
    %c0_82 = arith.constant 0 : index
    %95 = vector.load %arg5[%c0_79, %c0_80, %c0_81, %c0_82] : memref<1x4x8x8xf32, #tpu.memory_space<vmem>>, vector<1x4x8x8xf32>
    %96 = vector.shape_cast %95 : vector<1x4x8x8xf32> to vector<4x8x8xf32>
    %97 = vector.shape_cast %94 : vector<4x8x8xf32> to vector<1x4x8x8xf32>
    tpu.vector_store %arg5[%c0_79, %c0_80, %c0_81, %c0_82], %97 {strides = array<i32>} : memref<1x4x8x8xf32, #tpu.memory_space<vmem>>, vector<1x4x8x8xf32>,
    return
  }
  func.func @transform_0(%arg0: i32, %arg1: i32) -> (i32, i32, i32, i32) {
    %c0_i32 = arith.constant 0 : i32
    %c0_i32_0 = arith.constant 0 : i32
    %c0_i32_1 = arith.constant 0 : i32
    return %arg0, %c0_i32, %arg1, %c0_i32_0 : i32, i32, i32, i32
  }
  func.func @transform_1(%arg0: i32, %arg1: i32) -> (i32, i32) {
    %c0_i32 = arith.constant 0 : i32
    %c0_i32_0 = arith.constant 0 : i32
    %c0_i32_1 = arith.constant 0 : i32
    return %c0_i32, %c0_i32_0 : i32, i32
  }
  func.func @transform_2(%arg0: i32, %arg1: i32) -> (i32, i32) {
    %c0_i32 = arith.constant 0 : i32
    %c0_i32_0 = arith.constant 0 : i32
    %c0_i32_1 = arith.constant 0 : i32
    return %c0_i32, %c0_i32_0 : i32, i32
  }
  func.func @transform_3(%arg0: i32, %arg1: i32) -> (i32, i32, i32, i32) {
    %c0_i32 = arith.constant 0 : i32
    %c0_i32_0 = arith.constant 0 : i32
    %c0_i32_1 = arith.constant 0 : i32
    return %arg0, %c0_i32, %arg1, %c0_i32_0 : i32, i32, i32, i32
  }
}

</mosaic_0001>

<bundles_post_ra>
// kernel: tpu_custom_call.1
= control target key start
LH: loop header
LB: loop body
LE: loop exit
PB: predicated region body
PF: predicated region fallthrough
CT: control target
= control target key end

     0   :  { %8 = vsyncpa [#allocation5], 0  ;;  %s1149_s0 = inlined_call_operand.vmem [shape: f32[2,4,8,32], index: 0, kind: input, shape index: {}]   ;;  %s1150_s1 = inlined_call_operand.vmem [shape: bf16[192,32], index: 1, kind: input, shape index: {}]   ;;  %s1151_s2 = inlined_call_operand.vmem [shape: f32[1,32], index: 2, kind: input, shape index: {}]   ;;  %s1152_s3 = inlined_call_operand.hbm [shape: f32[2,4,8,8], index: 3, kind: output, shape index: {}]  }
   0x1   :  { %10 = vsyncpa [#allocation5 + $0x1], 0  ;;  %s941_s12 = smov 0   ;;  %s943_s13 = smov 0  }
   0x2   :  { %s945_s14 = smov 0   ;;  %s947_s15 = smov 0  }
   0x3   :  { %s949_s16 = smov 0   ;;  %s951_s17 = smov 0  }
   0x4 LB: > { %s683_s18 = sadd.s32 4294967295, %s906_s17   ;;  %s684_s19 = sadd.s32 4294967294, %s906_s17   ;;  %s906_s17 = sphi %s951_s17, %s16_s17   ;;  %s902_s16 = sphi %s949_s16, %s1159_s16   ;;  %s898_s15 = sphi %s947_s15, %s1158_s15   ;;  %s894_s14 = sphi %s945_s14, %s1157_s14   ;;  %s890_s13 = sphi %s943_s13, %s1156_s13   ;;  %s886_s12 = sphi %s941_s12, %s1155_s12  }
   0x5   : > { %s28_s20 = sadd.s32 1, %s902_s16  ;;  %s107_s21 = sadd.s32 1, %s894_s14 }
   0x6   : > { %p30_p0 = scmp.ge.s32.totalorder %s28_s20, 2  ;;  %p117_p1 = scmp.ne.s32.totalorder %s894_s14, %s890_s13 }
   0x7   : > { %p118_p2 = scmp.eq.s32.totalorder %s683_s18, 1  ;;  %p123_p3 = scmp.ne.s32.totalorder %s890_s13, %s886_s12 }
   0x8   : > { %s1161_s20 = smov (%p30_p0, %s28_s20), 0  ;;  %p124_p5 = scmp.eq.s32.totalorder %s684_s19, 1 }
   0x9   : > { %p981_p4 = por %p118_p2, %p117_p1  ;;  %s102_s23 = ssub.s32 %s902_s16, %s1161_s20 }
   0xa   : > { %p687_p6 = scmp.ge.s32.totalorder %s906_s17, 1  ;;  %p105_p7 = scmp.eq.s32.totalorder %s102_s23, 0 }
   0xb   : > { %p988_p8 = por %p124_p5, %p123_p3  ;;  %p159_p9 = scmp.lt.s32.totalorder %s906_s17, 3 }
   0xc   : > { %s994_s25 = scalar_select %p105_p7, %s894_s14, %s107_s21  }
   0xd   : > { %p160_p10 = pnand %p687_p6, %p159_p9 }
   0xe   : > { %p186_p11 = scmp.lt.s32.totalorder (!%p160_p10), %s898_s15, 1  ;;  %s909_s27 = smov (!%p160_p10), 112  }
   0xf   : > { %163 = sbr.rel (%p160_p10) target bundleno = 546 (0x222), region = 32  ;;  %s911_s7 = smov (!%p160_p10), 16  }
  0x10   : > { %s912_s21 = smov (!%p160_p10), 32   ;;  %s913_s28 = smov (!%p160_p10), 64  }
  0x11   : > { %s914_s4 = smov (!%p160_p10), 80   ;;  %s915_s5 = smov (!%p160_p10), 96  }
  0x12   : > { %s916_s8 = smov (!%p160_p10), 120   ;;  %s917_s10 = smov (!%p160_p10), 104  }
  0x13   : > { %s748_s18 = sshll.u32 (!%p160_p10), %s898_s15, 9  ;;  %s918_s23 = smov (!%p160_p10), [#allocation4]  }
  0x14   : > { %v908_v0 = vmov 0.0|0.0   ;;  %s187_s26 = scalar_select %p186_p11, %s898_s15, 1  ;;  %v816_v3 = vld [vmem:[%s1150_s1 + $0x38] sm:$0xff]   ;;  %v910_v4 = vmov 0   ;;  %v817_v14 = vld [vmem:[%s1150_s1 + $0x30] sm:$0xff]   ;;  %v818_v18 = vld [vmem:[%s1150_s1 + $0x28] sm:$0xff]  }
  0x15   : > { %v997_v1 = vcombine.low %v908_v0, %v908_v0  ;;  %535 = vmatprep.subr.bf16.mxu0 %v910_v4  ;;  %v819_v25 = vld [vmem:[%s1150_s1 + $0x20] sm:$0xff]   ;;  %v820_v30 = vld [vmem:[%s1150_s1 + $0x18] sm:$0xff]   ;;  %v821_v34 = vld [vmem:[%s1150_s1 + $0x10] sm:$0xff]   ;;  %vm208_vm0 = vcmask 122880   ;;  %vm209_vm1 = vsmask.f32 256 }
  0x16   : > { %s736_s30 = sshll.u32 %s187_s26, 5  ;;  %536 = vmatpush1.bf16.msra.mxu0 %v816_v3  ;;  %v822_v38 = vld [vmem:[%s1150_s1 + $0x8] sm:$0xff]   ;;  %v823_v39 = vld [vmem:[%s1150_s1] sm:$0xff]   ;;  %v824_v40 = vld [vmem:[%s1150_s1 + $0x58] sm:$0xff]   ;;  %vm229_vm3 = vcmask 125952   ;;  %vm241_vm6 = vcmask 254080  }
  0x17   : > { %205 = vrot.lane.b32.xlu0 %v997_v1, %s909_s27  ;;  %v696_v2 = vrot.slane %v997_v1, 9  ;;  %s1010_s6 = scalar_lea.vmem %s1149_s0, %s736_s30  ;;  %537 = vmatprep.subr.bf16.mxu0 %v910_v4  ;;  %v236_v12 = vshrl.u32 %v997_v1, 16  ;;  %v825_v41 = vld [vmem:[%s1150_s1 + $0x50] sm:$0xff]   ;;  %v826_v42 = vld [vmem:[%s1150_s1 + $0x48] sm:$0xff]   ;;  %v827_v43 = vld [vmem:[%s1150_s1 + $0x40] sm:$0xff]   ;;  %vm260_vm8 = vcmask 257152  }
  0x18   : > { %v214_v5 = vld [vmem:[%s1010_s6] sm:$0x7f]  ;;  %v697_v7 = vld [vmem:[%s1010_s6 + $0x10] sm:$0x7f]  ;;  %v700_v8 = vld [vmem:[%s1010_s6 + $0x18] sm:$0x7f] }
  0x19   : > { %267 = vrot.lane.b32.xlu1 %v696_v2, %s911_s7  ;;  %v737_v6 = vpack.c.bf16 %v214_v5, %v214_v5  ;;  %v739_v11 = vpack.c.bf16 %v697_v7, %v697_v7  ;;  %v740_v13 = vpack.c.bf16 %v700_v8, %v700_v8  ;;  %v367_v22 = vld [vmem:[%s1010_s6] sm:$0xff]  ;;  %v699_v24 = vrot.slane %v236_v12, 9  ;;  %v703_v29 = vld [vmem:[%s1010_s6 + $0x8] sm:$0xff]  ;;  %v705_v32 = vld [vmem:[%s1010_s6 + $0x10] sm:$0xff]  ;;  %s834_s26 = sshll.u32 %s918_s23, 4  ;;  %s835_s26 = int_to_ptr.vmem [resolvable:$false] %s834_s26 }
  0x1a   : > { %538 = vmatpush1.bf16.msra.mxu0 %v817_v14  ;;  %v745_v26 = vpack.c.bf16 %v367_v22, %v367_v22  ;;  %v742_v33 = vpack.c.bf16 %v703_v29, %v703_v29  ;;  %v743_v35 = vpack.c.bf16 %v705_v32, %v705_v32  ;;  %v707_v36 = vld [vmem:[%s1010_s6 + $0x18] sm:$0xff]  ;;  %vm210_vm2 = vmand %vm208_vm0, %vm209_vm1  ;;  %v211_v44 = vld [vmem:[#allocation2] sm:$0x1]  ;;  %vm230_vm4 = vsmask.f32 7938 }
  0x1b   : > { %v220_v9 = vshrl.u32 %v737_v6, 16  ;;  %v223_v10 = vshll.u32 %v737_v6, 16  ;;  %v282_v16 = vshrl.u32 %v739_v11, 16  ;;  %v285_v17 = vshll.u32 %v739_v11, 16  ;;  %539 = vmatprep.subr.bf16.mxu0 %v910_v4  ;;  %vm231_vm5 = vmand %vm229_vm3, %vm230_vm4  ;;  %v694_v50 = vld [vmem:[%s1010_s6 + $0x8] sm:$0x7f] }
  0x1c   : > { %v313_v21 = vshrl.u32 %v740_v13, 16  ;;  %v316_v28 = vshll.u32 %v740_v13, 16  ;;  %v744_v37 = vpack.c.bf16 %v707_v36, %v707_v36  ;;  %v738_v53 = vpack.c.bf16 %v694_v50, %v694_v50  ;;  %vm242_vm7 = vmand %vm241_vm6, %vm209_vm1  ;;  %s183_s6 = sand.u32 1, %s890_s13  }
  0x1d   : > { %v222_v15 = vrot.slane %v220_v9, 7  ;;  %v284_v20 = vrot.slane %v282_v16, 7  ;;  %vm261_vm9 = vmand %vm260_vm8, %vm230_vm4  ;;  %vm291_vm10 = vcmask 388352   ;;  %vm322_vm11 = vcmask 519552   ;;  %s688_s30 = sshll.u32 %s183_s6, 5  ;;  %s1104_s15 = scalar_lea.sflag [#allocation5], %s183_s6 }
  0x1e   : > { %540 = vmatpush1.bf16.msra.mxu0 %v818_v18  ;;  %v315_v27 = vrot.slane %v313_v21, 7  ;;  %v253_v56 = vshrl.u32 %v738_v53, 16  ;;  %v256_v61 = vshll.u32 %v738_v53, 16  ;;  %vm270_vm12 = vcmask 385280   ;;  %vm292_vm14 = vmand %vm291_vm10, %vm230_vm4  ;;  %v715_v18 = vld [vmem:[%s1151_s2] ss:$0 sm:$0xff] }
  0x1f   : > { %v225_v19 = vor.u32 %v223_v10, %v222_v15  ;;  %v287_v23 = vor.u32 %v285_v17, %v284_v20  ;;  %541 = vmatprep.subr.bf16.mxu0 %v910_v4  ;;  %vm271_vm13 = vmand %vm270_vm12, %vm209_vm1  ;;  %vm301_vm15 = vcmask 516480   ;;  %vm355_vm6 = vcmask 913152   ;;  %s185_s9 = scalar_lea.vmem [#allocation4], %s688_s30 }
  0x20   : > { %v318_v31 = vor.u32 %v316_v28, %v315_v27  ;;  %v255_v60 = vrot.slane %v253_v56, 7  ;;  %vm302_vm0 = vmand %vm301_vm15, %vm209_vm1  ;;  %vm531_vm1 = vcmask 523264   ;;  %s605_s11 = sshll.u32 %s185_s9, 4  ;;  %s1096_s11 = int_to_ptr.vmem [resolvable:$true] %s605_s11 }
  0x21   : > { %226 = vrot.lane.b32.xlu0 %v225_v19, %s909_s27  ;;  %288 = vrot.lane.b32.xlu1 %v287_v23, %s911_s7  ;;  %p837_p1 = scmp.lt.s32.totalorder %s1096_s11, %s835_s26 }
  0x22   : > { %542 = vmatpush1.bf16.msra.mxu0 %v819_v25  ;;  %v258_v63 = vor.u32 %v256_v61, %v255_v60 }
  0x23   : > { %543 = vmatprep.subr.bf16.mxu0 %v910_v4 }
  0x25   : > { %298 = vrot.lane.b32.xlu0 %v699_v24, %s912_s21  ;;  %372 = vrot.lane.b32.xlu1 %v745_v26, %s909_s27 }
  0x26   : > { %544 = vmatpush1.bf16.msra.mxu0 %v820_v30 }
  0x27   : > { %545 = vmatprep.subr.bf16.mxu0 %v910_v4 }
  0x29   : > { %332 = vrot.lane.b32.xlu0 %v745_v26, %s913_s28  ;;  %319 = vrot.lane.b32.xlu1 %v318_v31, %s912_s21  ;;  %s836_s28 = scalar_lea.vmem %s835_s26, 1024 }
  0x2a   : > { %546 = vmatpush1.bf16.msra.mxu0 %v821_v34 }
  0x2b   : > { %547 = vmatprep.subr.bf16.mxu0 %v910_v4 }
  0x2d   : > { %342 = vrot.lane.b32.xlu0 %v742_v33, %s914_s4  ;;  %352 = vrot.lane.b32.xlu1 %v743_v35, %s915_s5 }
  0x2e   : > { %548 = vmatpush1.bf16.msra.mxu0 %v822_v38 }
  0x2f   : > { %549 = vmatprep.subr.bf16.mxu0 %v910_v4 }
  0x31   : > { %386 = vrot.lane.b32.xlu0 %v743_v35, %s911_s7  ;;  %362 = vrot.lane.b32.xlu1 %v744_v37, %s909_s27  ;;  %s1101_s7 = scalar_lea.hbm %s1152_s3, %s748_s18 }
  0x32   : > { %550 = vmatpush1.bf16.msra.mxu0 %v823_v39 }
  0x33   : > { %559 = vmatprep.subr.bf16.mxu0 %v910_v4 }
  0x35   : > { %396 = vrot.lane.b32.xlu0 %v744_v37, %s912_s21  ;;  %s830_s21 = scalar_lea.vmem %s1096_s11, 512 }
  0x36   : > { %560 = vmatpush2.bf16.msra.mxu0 %v824_v40  ;;  %p831_p12 = scmp.ne.s32.totalorder %s1096_s11, %s830_s21  ;;  %p838_p2 = scmp.lt.s32.totalorder %s836_s28, %s830_s21 }
  0x37   : > { %561 = vmatprep.subr.bf16.mxu0 %v910_v4 }
  0x38   : > { %p832_p13 = pnand %p831_p12, %p981_p4  ;;  %p839_p3 = por %p838_p2, %p837_p1 }
  0x3a   : > { %562 = vmatpush2.bf16.msra.mxu0 %v825_v41  ;;  %p833_p0 = pneg %p832_p13 }
  0x3b   : > { %563 = vmatprep.subr.bf16.mxu0 %v910_v4 }
  0x3c   : > { %p840_p5 = pnand %p839_p3, %p833_p0 }
  0x3e   : > { %564 = vmatpush2.bf16.msra.mxu0 %v826_v42 }
  0x3f   : > { %565 = vmatprep.subr.bf16.mxu0 %v910_v4 }
  0x42   : > { %566 = vmatpush2.bf16.msra.mxu0 %v827_v43 }
  0x89   : > { %v206_v45 = vpop.permute.xlu0 %205 }
  0x8a   : > { %v212_v46 = vsel %vm210_vm2, %v206_v45, %v211_v44  ;;  %vm323_vm2 = vmand %vm322_vm11, %vm230_vm4  ;;  %vm585_vm4 = vcmask 64512  }
  0x8b   : > { %213 = vst [vmem:[#allocation2] sm:$0x1] %v212_v46  ;;  %v268_v48 = vpop.permute.xlu1 %267 }
  0x92   : > { %v232_v47 = vld [vmem:[#allocation2] sm:$0xf] }
  0x93   : > { %v227_v49 = vpop.permute.xlu0 %226  ;;  %v289_v52 = vpop.permute.xlu1 %288 }
  0x94   : > { %v233_v51 = vsel %vm231_vm5, %v227_v49, %v232_v47  ;;  %vm345_vm5 = vcmask 781952  }
  0x95   : > { %234 = vst [vmem:[#allocation2] sm:$0xf] %v233_v51 }
  0x97   : > { %v299_v54 = vpop.permute.xlu0 %298  ;;  %v373_v55 = vpop.permute.xlu1 %372 }
  0x98   : > { %376 = vst.msk [vmem:[#allocation2 + $0x4] sm:$0xf] %vm229_vm3, %v373_v55  ;;  %vm335_vm3 = vcmask 650752  }
  0x99   : > { %380 = vst.msk [vmem:[#allocation2 + $0x4] sm:$0xf] %vm260_vm8, %v742_v33 }
  0x9b   : > { %v333_v57 = vpop.permute.xlu0 %332  ;;  %v320_v8 = vpop.permute.xlu1 %319 }
  0x9c   : > { %v243_v58 = vld [vmem:[#allocation2] sm:$0x1] }
  0x9d   : > { %v244_v59 = vsel %vm242_vm7, %v236_v12, %v243_v58  ;;  %vm365_vm7 = vcmask 1044352  }
  0x9e   : > { %245 = vst [vmem:[#allocation2] sm:$0x1] %v244_v59 }
  0x9f   : > { %v343_v62 = vpop.permute.xlu0 %342  ;;  %v353_v11 = vpop.permute.xlu1 %352 }
  0xa3   : > { %v387_v0 = vpop.permute.xlu0 %386  ;;  %v363_v14 = vpop.permute.xlu1 %362 }
  0xa4   : > { %390 = vst.msk [vmem:[#allocation2 + $0x4] sm:$0xf] %vm291_vm10, %v387_v0 }
  0xa5   : > { %v262_v2 = vld [vmem:[#allocation2] sm:$0xf] }
  0xa6   : > { %v263_v3 = vsel %vm261_vm9, %v258_v63, %v262_v2 }
  0xa7   : > { %264 = vst [vmem:[#allocation2] sm:$0xf] %v263_v3  ;;  %v397_v4 = vpop.permute.xlu0 %396 }
  0xa8   : > { %400 = vst.msk [vmem:[#allocation2 + $0x4] sm:$0xf] %vm322_vm11, %v397_v4 }
  0xae   : > { %v272_v1 = vld [vmem:[#allocation2] sm:$0x1] }
  0xaf   : > { %v273_v5 = vsel %vm271_vm13, %v268_v48, %v272_v1 }
  0xb0   : > { %274 = vst [vmem:[#allocation2] sm:$0x1] %v273_v5 }
  0xb7   : > { %v293_v6 = vld [vmem:[#allocation2] sm:$0xf] }
  0xb8   : > { %v294_v7 = vsel %vm292_vm14, %v289_v52, %v293_v6 }
  0xb9   : > { %295 = vst [vmem:[#allocation2] sm:$0xf] %v294_v7 }
  0xc0   : > { %v303_v9 = vld [vmem:[#allocation2] sm:$0x1] }
  0xc1   : > { %v304_v10 = vsel %vm302_vm0, %v299_v54, %v303_v9 }
  0xc2   : > { %305 = vst [vmem:[#allocation2] sm:$0x1] %v304_v10 }
  0xc9   : > { %v324_v12 = vld [vmem:[#allocation2] sm:$0xf] }
  0xca   : > { %v325_v13 = vsel %vm323_vm2, %v320_v8, %v324_v12 }
  0xcb   : > { %326 = vst [vmem:[#allocation2] sm:$0xf] %v325_v13 }
  0xcc   : > { %336 = vst.msk [vmem:[#allocation2] sm:$0xf] %vm335_vm3, %v333_v57 }
  0xcd   : > { %346 = vst.msk [vmem:[#allocation2] sm:$0xf] %vm345_vm5, %v343_v62 }
  0xce   : > { %356 = vst.msk [vmem:[#allocation2] sm:$0xf] %vm355_vm6, %v353_v11 }
  0xcf   : > { %366 = vst.msk [vmem:[#allocation2] sm:$0xf] %vm365_vm7, %v363_v14 }
  0xd6   : > { %v421_v15 = vld [vmem:[#allocation2] sm:$0xff] }
  0xd7   : > { %v716_v16 = vcombine.low %v421_v15, %v421_v15  ;;  %v717_v17 = vcombine.high %v421_v15, %v421_v15 }
  0xd9   : > { %730 = vmatprep.mubr.msk.bf16.mxu0 %vm531_vm1, %v717_v17 }
  0xda   : > { %568 = vmatmul.mubr.bf16.vlgmr.msra.gmra.mxu0 %v716_v16 }
 0x19a   : > { %v569_v19 = vpop.f32.mrf.mxu0 }
 0x19b   : > { %v570_v20 = vadd.f32 %v715_v18, %v569_v19 }
 0x19c   : > { %v571_v21 = vpop.f32.mrf.mxu0 }
 0x19d   : > { %579 = vrot.lane.b32.xlu0 %v570_v20, %s909_s27  ;;  %576 = vrot.lane.b32.xlu1 %v570_v20, %s916_s8  ;;  %586 = vst.msk [vmem:[%s185_s9] sm:$0xff] %vm585_vm4, %v570_v20 }
 0x19e   : > { %v572_v22 = vpop.f32.mrf.mxu0 }
 0x1a0   : > { %v573_v23 = vpop.f32.mrf.mxu0 }
 0x1a1   : > { %582 = vrot.lane.b32.xlu1 %v570_v20, %s917_s10 }
 0x20f   : > { %v580_v24 = vpop.permute.xlu0 %579  ;;  %v577_v25 = vpop.permute.xlu1 %576 }
 0x210   : > { %588 = vst.msk [vmem:[%s185_s9 + $0x10] sm:$0xff] %vm585_vm4, %v580_v24  ;;  %587 = vst.msk [vmem:[%s185_s9 + $0x8] sm:$0xff] %vm585_vm4, %v577_v25 }
 0x213   : > { %v583_v26 = vpop.permute.xlu1 %582 }
 0x214   : > { %589 = vst.msk [vmem:[%s185_s9 + $0x18] sm:$0xff] %vm585_vm4, %v583_v26 }
 0x215   : > { %843 = shalt.err (!%p840_p5)
}
 0x216   : > { %s844_s29 = scalar_lea.hbm %s1101_s7, 512  ;;  %s848_s4 = scalar_lea.hbm %s1152_s3, 1024 }
 0x217   : > { %p845_p6 = scmp.ne.s32.totalorder %s1101_s7, %s844_s29  ;;  %p849_p10 = scmp.lt.s32.totalorder %s1101_s7, %s1152_s3 }
 0x218   : > { %p850_p11 = scmp.lt.s32.totalorder %s848_s4, %s844_s29 }
 0x219   : > { %p846_p7 = pnand %p845_p6, %p981_p4 }
 0x21a   : > { %p851_p12 = por %p850_p11, %p849_p10 }
 0x21b   : > { %p847_p9 = pneg %p846_p7 }
 0x21d   : > { %p852_p13 = pnand %p851_p12, %p847_p9 }
 0x21f   : > { %855 = shalt.err (!%p852_p13)
}
 0x220   : > { %s919_s9 = smov 128   ;;  %s920_s10 = smov 8  }
 0x221   : > { %749 = dma.vmem_to_hbm [thread:$0]  (%p981_p4), %s1096_s11, 512, %s1101_s7, %s1104_s15, %s919_s9, %s919_s9, %s920_s10  }
 0x222 PF: > { %p755_p0 = scmp.ge.s32.totalorder %s906_s17, 2  ;;  %s620_s18 = sand.u32 1, %s886_s12  }
 0x223   : > { %s621_s27 = scalar_lea.sflag [#allocation5], %s620_s18 }
 0x224   : > { %p752_p1 = pnand %p755_p0, %p988_p8 }
 0x226   : > { %p753_p2 = pneg %p752_p1 }
 0x228   : > { %881 = dma.done.wait (%p753_p2), %s621_s27, 512  }
 0x229   : > { %883 = vsyncadd (%p753_p2), %s621_s27, 4294966784  ;;  %s16_s17 = sadd.s32 1, %s906_s17   ;;  %s1155_s12 = smov %s890_s13 }
 0x22a   : > { %p13_p3 = scmp.ge.s32.totalorder %s16_s17, 4   ;;  %s1156_s13 = smov %s894_s14 }
 0x22b   : > { %s1157_s14 = smov %s994_s25  ;;  %s1158_s15 = smov %s902_s16 }
 0x22c   : > { %s1159_s16 = smov %s1161_s20  ;;  %15 = sbr.rel (!%p13_p3) target bundleno = 4 (0x4), region = 70 }
 0x231   :  { %626 = vsyncpa [#allocation5], 1 }
 0x232   :  { %628 = vsyncpa [#allocation5 + $0x1], 1 }

</bundles_post_ra>
